<compile_context>
chip_gen: v6e
topology: v6e:2x2x1
jax: 0.10.0
libtpu: 0.0.40
codegen_flags: <defaults>
</compile_context>

<pallas_src>
import jax
import jax.numpy as jnp
from jax import lax
from jax.experimental import pallas as pl
from jax.experimental.pallas import tpu as pltpu

LANES = 128
SUBLANES = 8
TILE_ROWS = 8192        # 8192 * 128 * 4 B = 4 MiB per f32 input block
NCORES_MAX = 2          # partial-sum slots (megacore); harmless on 1-TC parts
VMEM_LIMIT_BYTES = 48 * 1024 * 1024


def _make_mse_kernel(tile_rows, rows_total, steps_per_core, needs_mask):
    """Build the kernel closed over static tiling parameters."""
    assert tile_rows % SUBLANES == 0
    folds = tile_rows // SUBLANES

    def _fold_sum(vals):
        # (tile_rows, 128) -> (folds, 8, 128) -> (8, 128): vreg-wise VPU adds,
        # no cross-lane / cross-sublane movement.
        return jnp.sum(vals.reshape(folds, SUBLANES, LANES), axis=0)

    def kernel(pred_ref, gt_ref, out_ref, acc_ref):
        i = pl.program_id(1)          # reduction ("arbitrary") axis

        @pl.when(i == 0)
        def _():
            acc_ref[...] = jnp.zeros_like(acc_ref)

        d = pred_ref[...].astype(jnp.float32) - gt_ref[...].astype(jnp.float32)
        sq = d * d

        if needs_mask:
            c = pl.program_id(0)
            row_base = (c * steps_per_core + i) * tile_rows   # UNclamped base
            is_full = row_base + tile_rows <= rows_total

            @pl.when(is_full)
            def _():
                acc_ref[...] += _fold_sum(sq)

            @pl.when(jnp.logical_not(is_full))
            def _():
                # Edge / clamped-duplicate block: mask with a true select so
                # undefined OOB contents never reach the sum.
                row_ids = (lax.broadcasted_iota(jnp.int32, (tile_rows, LANES), 0)
                           + row_base)
                sq_m = jnp.where(row_ids < rows_total, sq, jnp.float32(0.0))
                acc_ref[...] += _fold_sum(sq_m)
        else:
            acc_ref[...] += _fold_sum(sq)

        @pl.when(i == pl.num_programs(1) - 1)
        def _():
            # Single cross-sublane reduce per core, lane-dense (1, 128) output.
            out_ref[...] = jnp.sum(acc_ref[...], axis=0, keepdims=True)

    return kernel


def _bulk_sq_sum(pred2d: jax.Array, gt2d: jax.Array) -> jax.Array:
    """Sum of squared differences over a (rows, 128) slab via Pallas.

    Requires rows >= 8 (smaller slabs are handled in plain JAX by the caller).
    """
    rows = pred2d.shape[0]
    assert rows >= SUBLANES

    # Pick a tile height: always a multiple of 8 so the (8,128) constraint and
    # the fold-reshape both hold.
    if rows >= TILE_ROWS:
        tile_rows = TILE_ROWS
    elif rows % SUBLANES == 0:
        tile_rows = rows              # single block == full array extent
    else:
        tile_rows = SUBLANES

    n_blocks = (rows + tile_rows - 1) // tile_rows
    ncores = min(NCORES_MAX, n_blocks)
    steps_per_core = (n_blocks + ncores - 1) // ncores
    needs_clamp = steps_per_core * ncores != n_blocks
    needs_mask = (rows % tile_rows != 0) or needs_clamp

    def in_map(c, i):
        blk = c * steps_per_core + i
        if needs_clamp:
            blk = jnp.minimum(blk, n_blocks - 1)   # keep DMA in range; mask zeroes it
        return (blk, 0)

    itemsize = jnp.dtype(pred2d.dtype).itemsize
    n_elems = rows * LANES
    cost = pl.CostEstimate(
        flops=3 * n_elems,
        transcendentals=0,
        bytes_accessed=2 * n_elems * itemsize + ncores * LANES * 4,
    )

    partials = pl.pallas_call(
        _make_mse_kernel(tile_rows, rows, steps_per_core, needs_mask),
        out_shape=jax.ShapeDtypeStruct((ncores, 1, LANES), jnp.float32),
        grid_spec=pltpu.PrefetchScalarGridSpec(
            num_scalar_prefetch=0,
            grid=(ncores, steps_per_core),
            in_specs=[
                pl.BlockSpec((tile_rows, LANES), in_map),
                pl.BlockSpec((tile_rows, LANES), in_map),
            ],
            out_specs=pl.BlockSpec((None, 1, LANES), lambda c, i: (c, 0, 0)),
            scratch_shapes=[pltpu.VMEM((SUBLANES, LANES), jnp.float32)],
        ),
        compiler_params=pltpu.CompilerParams(
            dimension_semantics=("parallel", "arbitrary"),
            vmem_limit_bytes=VMEM_LIMIT_BYTES,
        ),
        cost_estimate=cost,
    )(pred2d, gt2d)

    return jnp.sum(partials)


def mse_loss(pred: jax.Array, gt: jax.Array) -> jax.Array:
    """Equivalent of torch.mean((pred - gt) ** 2) for same-shaped inputs."""
    assert pred.shape == gt.shape, "pred / gt must have the same shape"
    n_elems = pred.size

    pred_f = pred.reshape(-1)
    gt_f = gt.reshape(-1)

    rem = n_elems % LANES
    bulk = n_elems - rem
    rows = bulk // LANES

    total = jnp.float32(0.0)
    tail_start = 0

    if rows >= SUBLANES:
        if rem == 0:
            pb = pred_f.reshape(-1, LANES)          # free reshape, no copy
            gb = gt_f.reshape(-1, LANES)
        else:
            pb = pred_f[:bulk].reshape(-1, LANES)
            gb = gt_f[:bulk].reshape(-1, LANES)
        total = total + _bulk_sq_sum(pb, gb)
        tail_start = bulk

    if tail_start < n_elems:
        tp = pred_f[tail_start:].astype(jnp.float32)
        tg = gt_f[tail_start:].astype(jnp.float32)
        total = total + jnp.sum((tp - tg) ** 2)

    # Note: single-pass f32 accumulation; matches torch f32 semantics to ~1e-6.
    return (total / jnp.float32(n_elems)).astype(jnp.float32)


if __name__ == "__main__":
    key = jax.random.PRNGKey(0)
    k1, k2, k3, k4 = jax.random.split(key, 4)

    # Primary case: NCHW input as the PyTorch module would receive.
    shape = (2, 4, 16, 16)
    pred = jax.random.normal(k1, shape, dtype=jnp.float32)
    gt = jax.random.normal(k2, shape, dtype=jnp.float32)

    loss = mse_loss(pred, gt)
    jax.block_until_ready(loss)
    ref = jnp.mean((pred - gt) ** 2)
    assert jnp.allclose(loss, ref, rtol=1e-5, atol=1e-6), (loss, ref)

    # Secondary case: exercises the gated in-kernel edge mask and the JAX tail.
    shape2 = (3, 5, 7, 11)
    pred2 = jax.random.normal(k3, shape2, dtype=jnp.float32)
    gt2 = jax.random.normal(k4, shape2, dtype=jnp.float32)

    loss2 = mse_loss(pred2, gt2)
    jax.block_until_ready(loss2)
    ref2 = jnp.mean((pred2 - gt2) ** 2)
    assert jnp.allclose(loss2, ref2, rtol=1e-5, atol=1e-6), (loss2, ref2)

    print("KERNEL_OK")
</pallas_src>

<mosaic_0001>
module attributes {stable_mosaic.version = 11 : i64} {
  func.func @kernel(%arg0: i32, %arg1: i32, %arg2: memref<16x128xf32, #tpu.memory_space<vmem>>, %arg3: memref<16x128xf32, #tpu.memory_space<vmem>>, %arg4: memref<1x1x128xf32, #tpu.memory_space<vmem>>, %arg5: memref<8x128xf32, #tpu.memory_space<vmem>>) attributes {dimension_semantics = [#tpu.dimension_semantics<parallel>, #tpu.dimension_semantics<arbitrary>], iteration_bounds = array<i64: 1, 1>, scalar_prefetch = 0 : i64, scratch_operands = 1 : i64, tpu.core_type = #tpu.core_type<tc>, window_params = [{transform_indices = @transform_0, window_bounds = array<i64: 16, 128>}, {transform_indices = @transform_1, window_bounds = array<i64: 16, 128>}, {transform_indices = @transform_2, window_bounds = array<i64: 1, 1, 128>}]} {
    %c0_i32 = arith.constant 0 : i32
    %0 = arith.cmpi eq, %arg1, %c0_i32 : i32
    %1 = arith.extui %0 : i1 to i32
    %c0_i32_0 = arith.constant 0 : i32
    %2 = arith.cmpi ne, %1, %c0_i32_0 : i32
    scf.if %2 {
      %cst_10 = arith.constant 0.000000e+00 : f32
      %15 = vector.broadcast %cst_10 : f32 to vector<8x128xf32>
      %c0_11 = arith.constant 0 : index
      %c0_12 = arith.constant 0 : index
      %16 = vector.load %arg5[%c0_11, %c0_12] : memref<8x128xf32, #tpu.memory_space<vmem>>, vector<8x128xf32>
      tpu.vector_store %arg5[%c0_11, %c0_12], %15 {strides = array<i32>} : memref<8x128xf32, #tpu.memory_space<vmem>>, vector<8x128xf32>,
    } else {
    }
    %c0 = arith.constant 0 : index
    %c0_1 = arith.constant 0 : index
    %3 = vector.load %arg2[%c0, %c0_1] : memref<16x128xf32, #tpu.memory_space<vmem>>, vector<16x128xf32>
    %c0_2 = arith.constant 0 : index
    %c0_3 = arith.constant 0 : index
    %4 = vector.load %arg3[%c0_2, %c0_3] : memref<16x128xf32, #tpu.memory_space<vmem>>, vector<16x128xf32>
    %5 = arith.subf %3, %4 : vector<16x128xf32>
    %6 = arith.mulf %5, %5 : vector<16x128xf32>
    %c0_4 = arith.constant 0 : index
    %c0_5 = arith.constant 0 : index
    %7 = vector.load %arg5[%c0_4, %c0_5] : memref<8x128xf32, #tpu.memory_space<vmem>>, vector<8x128xf32>
    %8 = vector.shape_cast %6 : vector<16x128xf32> to vector<2x8x128xf32>
    %cst = arith.constant dense<0.000000e+00> : vector<8x128xf32>
    %9 = vector.multi_reduction <add>, %8, %cst [0] : vector<2x8x128xf32> to vector<8x128xf32>
    %10 = arith.addf %7, %9 : vector<8x128xf32>
    %c0_6 = arith.constant 0 : index
    %c0_7 = arith.constant 0 : index
    %11 = vector.load %arg5[%c0_6, %c0_7] : memref<8x128xf32, #tpu.memory_space<vmem>>, vector<8x128xf32>
    tpu.vector_store %arg5[%c0_6, %c0_7], %10 {strides = array<i32>} : memref<8x128xf32, #tpu.memory_space<vmem>>, vector<8x128xf32>,
    %c0_i32_8 = arith.constant 0 : i32
    %12 = arith.cmpi eq, %arg1, %c0_i32_8 : i32
    %13 = arith.extui %12 : i1 to i32
    %c0_i32_9 = arith.constant 0 : i32
    %14 = arith.cmpi ne, %13, %c0_i32_9 : i32
    scf.if %14 {
      %c0_10 = arith.constant 0 : index
      %c0_11 = arith.constant 0 : index
      %15 = vector.load %arg5[%c0_10, %c0_11] : memref<8x128xf32, #tpu.memory_space<vmem>>, vector<8x128xf32>
      %cst_12 = arith.constant dense<0.000000e+00> : vector<128xf32>
      %16 = vector.multi_reduction <add>, %15, %cst_12 [0] : vector<8x128xf32> to vector<128xf32>
      %17 = vector.shape_cast %16 : vector<128xf32> to vector<1x128xf32>
      %c0_13 = arith.constant 0 : index
      %c0_14 = arith.constant 0 : index
      %c0_15 = arith.constant 0 : index
      %18 = vector.load %arg4[%c0_13, %c0_14, %c0_15] : memref<1x1x128xf32, #tpu.memory_space<vmem>>, vector<1x1x128xf32>
      %19 = vector.shape_cast %18 : vector<1x1x128xf32> to vector<1x128xf32>
      %20 = vector.shape_cast %17 : vector<1x128xf32> to vector<1x1x128xf32>
      tpu.vector_store %arg4[%c0_13, %c0_14, %c0_15], %20 {strides = array<i32>} : memref<1x1x128xf32, #tpu.memory_space<vmem>>, vector<1x1x128xf32>,
    } else {
    }
    return
  }
  func.func @transform_0(%arg0: i32, %arg1: i32) -> (i32, i32) {
    %c1_i32 = arith.constant 1 : i32
    %0 = arith.muli %arg0, %c1_i32 : i32
    %1 = arith.addi %0, %arg1 : i32
    %c0_i32 = arith.constant 0 : i32
    %c0_i32_0 = arith.constant 0 : i32
    return %1, %c0_i32 : i32, i32
  }
  func.func @transform_1(%arg0: i32, %arg1: i32) -> (i32, i32) {
    %c1_i32 = arith.constant 1 : i32
    %0 = arith.muli %arg0, %c1_i32 : i32
    %1 = arith.addi %0, %arg1 : i32
    %c0_i32 = arith.constant 0 : i32
    %c0_i32_0 = arith.constant 0 : i32
    return %1, %c0_i32 : i32, i32
  }
  func.func @transform_2(%arg0: i32, %arg1: i32) -> (i32, i32, i32) {
    %c0_i32 = arith.constant 0 : i32
    %c0_i32_0 = arith.constant 0 : i32
    %c0_i32_1 = arith.constant 0 : i32
    return %arg0, %c0_i32, %c0_i32_0 : i32, i32, i32
  }
}

</mosaic_0001>

<bundles_post_ra>
// kernel: tpu_custom_call.1
= control target key start
LH: loop header
LB: loop body
LE: loop exit
PB: predicated region body
PF: predicated region fallthrough
CT: control target
= control target key end

     0   :  { %7 = vsyncpa [#allocation4], 0  ;;  %s196_s0 = inlined_call_operand.hbm [shape: f32[16,128], index: 0, kind: input, shape index: {}]   ;;  %s197_s1 = inlined_call_operand.hbm [shape: f32[16,128], index: 1, kind: input, shape index: {}]   ;;  %s198_s2 = inlined_call_operand.hbm [shape: f32[1,1,128], index: 2, kind: output, shape index: {}]  }
   0x1   :  { %8 = vsyncpa [#allocation7], 0 }
   0x2   :  { %9 = vsyncpa [#allocation5], 0  ;;  %s167_s9 = smov [#allocation3]  }
   0x3   :  { %s19_s10 = sshll.u32 %s167_s9, 4  ;;  %s20_s10 = int_to_ptr.vmem [resolvable:$true] %s19_s10 }
   0x4   :  { %s109_s11 = scalar_lea.vmem %s20_s10, 256  ;;  %p114_p1 = scmp.lt.s32.totalorder %s20_s10, %s20_s10 }
   0x5   :  { %p110_p0 = scmp.ne.s32.totalorder %s20_s10, %s109_s11  ;;  %p115_p2 = scmp.lt.s32.totalorder %s109_s11, %s109_s11 }
   0x7   :  { %p116_p3 = por %p115_p2, %p114_p1 }
   0x9   :  { %p117_p4 = pnand %p116_p3, %p110_p0 }
   0xb   :  { %120 = shalt.err (!%p117_p4)
}
   0xc   :  { %s168_s12 = smov 128   ;;  %s169_s13 = smov 8  }
   0xd   :  { %25 = dma.hbm_to_vmem [thread:$0]  %s196_s0, 256, %s20_s10, [#allocation4], %s168_s12, %s168_s12, %s169_s13  }
   0xe   :  { %s170_s16 = smov [#allocation6]  }
   0xf   :  { %s35_s17 = sshll.u32 %s170_s16, 4  ;;  %s36_s17 = int_to_ptr.vmem [resolvable:$true] %s35_s17 }
  0x10   :  { %s129_s18 = scalar_lea.vmem %s36_s17, 256  ;;  %p134_p6 = scmp.lt.s32.totalorder %s36_s17, %s36_s17 }
  0x11   :  { %p130_p5 = scmp.ne.s32.totalorder %s36_s17, %s129_s18  ;;  %p135_p7 = scmp.lt.s32.totalorder %s129_s18, %s129_s18 }
  0x13   :  { %p136_p8 = por %p135_p7, %p134_p6 }
  0x15   :  { %p137_p9 = pnand %p136_p8, %p130_p5 }
  0x17   :  { %140 = shalt.err (!%p137_p9)
}
  0x18   :  { %41 = dma.hbm_to_vmem [thread:$0]  %s197_s1, 256, %s36_s17, [#allocation7], %s168_s12, %s168_s12, %s169_s13  }
  0x19   :  { %161 = dma.done.wait [#allocation4], 256  }
  0x1a   :  { %162 = vsyncadd [#allocation4], 4294967040 }
  0x1b   :  { %163 = dma.done.wait [#allocation7], 256  }
  0x1c   :  { %164 = vsyncadd [#allocation7], 4294967040  ;;  %v57_v0 = vld [vmem:[#allocation3] sm:$0xff]  ;;  %v58_v1 = vld [vmem:[#allocation3 + $0x8] sm:$0xff]  ;;  %s171_s0 = smov [#allocation8]  }
  0x1d   :  { %v59_v2 = vld [vmem:[#allocation6] sm:$0xff]  ;;  %v60_v3 = vld [vmem:[#allocation6 + $0x8] sm:$0xff]  ;;  %s86_s21 = sshll.u32 %s171_s0, 4  ;;  %s87_s21 = int_to_ptr.vmem [resolvable:$true] %s86_s21 }
  0x1e   :  { %v61_v4 = vsub.f32 %v57_v0, %v59_v2  ;;  %v62_v5 = vsub.f32 %v58_v1, %v60_v3  ;;  %s141_s1 = scalar_lea.vmem %s87_s21, 16  ;;  %s145_s22 = scalar_lea.vmem %s87_s21, 32 }
  0x1f   :  { %p142_p10 = scmp.ne.s32.totalorder %s87_s21, %s141_s1  ;;  %p146_p11 = scmp.lt.s32.totalorder %s87_s21, %s87_s21 }
  0x20   :  { %v63_v6 = vmul.f32 %v61_v4, %v61_v4  ;;  %v64_v7 = vmul.f32 %v62_v5, %v62_v5  ;;  %p147_p12 = scmp.lt.s32.totalorder %s145_s22, %s141_s1 }
  0x22   :  { %v66_v8 = vadd.f32 %v64_v7, %v63_v6  ;;  %p148_p13 = por %p147_p12, %p146_p11 }
  0x24   :  { %v73_v9 = vrot.slane %v66_v8, 4  ;;  %p149_p0 = pnand %p148_p13, %p142_p10 }
  0x26   :  { %v74_v10 = vadd.f32 %v73_v9, %v66_v8 }
  0x28   :  { %v75_v11 = vrot.slane %v74_v10, 2 }
  0x2a   :  { %v76_v12 = vadd.f32 %v75_v11, %v74_v10 }
  0x2c   :  { %v77_v13 = vrot.slane %v76_v12, 1 }
  0x2e   :  { %v78_v14 = vadd.f32 %v77_v13, %v76_v12 }
  0x30   :  { %79 = vst [vmem:[#allocation8] sm:$0x1] %v78_v14 }
  0x31   :  { %152 = shalt.err (!%p149_p0)
}
  0x32   :  { %89 = dma.vmem_to_hbm [thread:$0]  %s87_s21, 16, %s198_s2, [#allocation5]  }
  0x33   :  { %165 = dma.done.wait [#allocation5], 16  }
  0x34   :  { %166 = vsyncadd [#allocation5], 4294967280 }
  0x35   :  { %93 = vsyncpa [#allocation4], 1 }
  0x36   :  { %94 = vsyncpa [#allocation7], 1 }
  0x37   :  { %95 = vsyncpa [#allocation5], 1 }

</bundles_post_ra>
